<compile_context>
chip_gen: v7x
topology: tpu7x:2x2x1
jax: 0.10.0
libtpu: 0.0.40
codegen_flags: <defaults>
</compile_context>

<pallas_src>
import functools

import jax
import jax.numpy as jnp
from jax import lax
from jax.experimental import pallas as pl
from jax.experimental.pallas import tpu as pltpu

_BN_EPS = 1e-5


def _vmem_limit_bytes():
    """Generation-aware scoped-VMEM budget (~3/4 of physical, >=32MiB)."""
    cap = 64 * 1024 * 1024
    try:
        info = pltpu.get_tpu_info()
        cap = int(getattr(info, "vmem_capacity_bytes", cap) or cap)
    except Exception:  # pragma: no cover - query not available -> safe default
        pass
    return min(max(32 * 1024 * 1024, (cap * 3) // 4), 112 * 1024 * 1024)


# ---------------------------------------------------------------------------
# Fused Pallas kernel: conv1+BN1+ReLU6 + conv2+BN2 + SE + residual + ReLU6
# ---------------------------------------------------------------------------
def _se_basic_block_kernel(x_ref, m_ref, w1_ref, b1_ref, w2_ref, b2_ref,
                           sw1_ref, sw2_ref, *rest, H, W, d, has_down):
    """One batch element per grid step.

    Layout: channels on sublanes, flattened H*W on lanes (lane-dense).
      x_ref  : (1, Cin, H*W)   f32   block input (also residual source)
      m_ref  : (2, H*W)        bf16  0/1 lane masks for the dx = -d / +d taps
      w1_ref : (Cout, 9*Cin)   bf16  conv1 weight, BN1 scale folded (tap-major K)
      b1_ref : (Cout, 1)       f32   folded BN1 bias
      w2_ref : (Cout, 9*Cout)  bf16  conv2 weight, BN2 scale folded
      b2_ref : (Cout, 1)       f32   folded BN2 bias
      sw1_ref: (Cout, Cr)      f32   SE fc1 weight (stored transposed)
      sw2_ref: (Cout, Cr)      f32   SE fc2 weight (torch layout)
      rest   : (down_w (Cout,Cin), down_b (Cout,1), o_ref) if has_down
               else (o_ref,);   o_ref: (1, Cout, H*W) f32
    """
    if has_down:
        dw_ref, db_ref, o_ref = rest
    else:
        (o_ref,) = rest

    HW = H * W
    mask_l = m_ref[0:1, :]   # (1, HW) bf16, valid lanes for dx = -d
    mask_r = m_ref[1:2, :]   # (1, HW) bf16, valid lanes for dx = +d

    def conv3x3(act_b16, w_ref, b_ref):
        # act_b16: (C, HW) bf16.  One matmul with K = 9*C (in-MXU accumulation).
        c = act_b16.shape[0]
        pad = d * W + d                      # max |lane shift| over the 9 taps
        zpad = jnp.zeros((c, pad), act_b16.dtype)
        xe = jnp.concatenate([zpad, act_b16, zpad], axis=1)   # (C, HW + 2*pad)
        taps = []
        for ki in range(3):                  # static 3x3 tap loop (trace time)
            for kj in range(3):
                s = (ki - 1) * d * W + (kj - 1) * d
                p = xe[:, pad + s: pad + s + HW]              # lane shift by s
                if kj == 0:                                   # dx = -d
                    p = p * mask_l
                elif kj == 2:                                 # dx = +d
                    p = p * mask_r
                taps.append(p)
        patches = jnp.concatenate(taps, axis=0)               # (9*C, HW) bf16
        acc = jnp.dot(w_ref[...], patches,
                      preferred_element_type=jnp.float32)     # (Cout, HW) f32
        return acc + b_ref[...]

    x32 = x_ref[0]                                            # (Cin, HW) f32

    # conv1 + folded BN1 + ReLU6 (stays in VMEM / values)
    h = jnp.clip(conv3x3(x32.astype(jnp.bfloat16), w1_ref, b1_ref), 0.0, 6.0)

    # conv2 + folded BN2 (no activation before SE)
    out = conv3x3(h.astype(jnp.bfloat16), w2_ref, b2_ref)     # (Cout, HW) f32

    # SELayer: global avg pool -> fc -> ReLU -> fc -> sigmoid -> channel scale.
    # Tiny FCs done as broadcast-multiply + reductions (all f32, no tiny dots).
    pooled = jnp.mean(out, axis=1, keepdims=True)             # (Cout, 1)
    z = jnp.maximum(
        jnp.sum(sw1_ref[...] * pooled, axis=0, keepdims=True), 0.0)   # (1, Cr)
    gate = jax.nn.sigmoid(
        jnp.sum(sw2_ref[...] * z, axis=1, keepdims=True))             # (Cout, 1)

    # Residual branch: biased 1x1 conv (as in the module) or identity.
    if has_down:
        res = jnp.dot(dw_ref[...], x32,
                      preferred_element_type=jnp.float32) + db_ref[...]
    else:
        res = x32                                             # Cin == Cout

    y = jnp.clip(out * gate + res, 0.0, 6.0)                  # add + ReLU6
    o_ref[0] = y.astype(o_ref.dtype)


# ---------------------------------------------------------------------------
# pallas_call wrapper
# ---------------------------------------------------------------------------
def _se_basic_block_call(x, masks, w1, b1, w2, b2, sw1, sw2, down, *, H, W, d):
    N, cin, HW = x.shape
    cout = w1.shape[0]
    has_down = down is not None

    in_specs = [
        pl.BlockSpec((1, cin, HW), lambda n: (n, 0, 0)),   # x (per batch)
        pl.BlockSpec(masks.shape, lambda n: (0, 0)),       # lane masks
        pl.BlockSpec(w1.shape, lambda n: (0, 0)),
        pl.BlockSpec(b1.shape, lambda n: (0, 0)),
        pl.BlockSpec(w2.shape, lambda n: (0, 0)),
        pl.BlockSpec(b2.shape, lambda n: (0, 0)),
        pl.BlockSpec(sw1.shape, lambda n: (0, 0)),
        pl.BlockSpec(sw2.shape, lambda n: (0, 0)),
    ]
    args = [x, masks, w1, b1, w2, b2, sw1, sw2]
    if has_down:
        dw, db = down
        in_specs += [pl.BlockSpec(dw.shape, lambda n: (0, 0)),
                     pl.BlockSpec(db.shape, lambda n: (0, 0))]
        args += [dw, db]

    return pl.pallas_call(
        functools.partial(_se_basic_block_kernel, H=H, W=W, d=d,
                          has_down=has_down),
        out_shape=jax.ShapeDtypeStruct((N, cout, HW), jnp.float32),
        grid_spec=pltpu.PrefetchScalarGridSpec(
            num_scalar_prefetch=0,
            grid=(N,),
            in_specs=in_specs,
            out_specs=pl.BlockSpec((1, cout, HW), lambda n: (n, 0, 0)),
        ),
        compiler_params=pltpu.CompilerParams(
            dimension_semantics=("parallel",),
            vmem_limit_bytes=_vmem_limit_bytes()),
    )(*args)


# ---------------------------------------------------------------------------
# JAX glue: BN folding, parameter init, block wiring, pure-JAX reference
# ---------------------------------------------------------------------------
def _fold_bn(bn):
    scale = bn['gamma'] / jnp.sqrt(bn['var'] + _BN_EPS)
    bias = bn['beta'] - bn['mean'] * scale
    return scale, bias


def se_basic_block_forward(x_nchw, p, *, dilation=1):
    N, cin, H, W = x_nchw.shape
    d = dilation
    HW = H * W
    cout = p['w1'].shape[-1]

    x = x_nchw.reshape(N, cin, HW)                       # NCHW, spatial on lanes

    # Fold inference-mode BN into conv weights; tap-major K; bf16 MXU operands.
    s1, b1 = _fold_bn(p['bn1'])
    s2, b2 = _fold_bn(p['bn2'])
    w1 = (p['w1'] * s1).reshape(9 * cin, cout).T.astype(jnp.bfloat16)
    w2 = (p['w2'] * s2).reshape(9 * cout, cout).T.astype(jnp.bfloat16)
    b1 = b1.reshape(cout, 1)
    b2 = b2.reshape(cout, 1)

    # Static 0/1 lane masks for the horizontally shifted taps (built host-side,
    # loaded once): row 0 validates dx = -d (w >= d), row 1 dx = +d (w < W-d).
    wl = jnp.arange(HW, dtype=jnp.int32) % W
    masks = jnp.stack([(wl >= d), (wl < W - d)]).astype(jnp.bfloat16)

    down = None
    if 'down_w' in p:
        down = (p['down_w'], p['down_b'].reshape(cout, 1))

    y = _se_basic_block_call(x, masks, w1, b1, w2, b2,
                             p['se_w1'], p['se_w2'], down, H=H, W=W, d=d)
    return y.reshape(N, cout, H, W)                      # already NCHW


def init_se_basic_block(key, in_channels, out_channels, *, reduction=16):
    assert out_channels >= reduction, "SELayer needs out_channels//reduction >= 1"
    cr = out_channels // reduction
    ks = jax.random.split(key, 8)

    def w(k, shape, s=0.1):
        return s * jax.random.normal(k, shape, dtype=jnp.float32)

    def bn(k, c):
        k0, k1, k2, k3 = jax.random.split(k, 4)
        return dict(
            gamma=1.0 + 0.1 * jax.random.normal(k0, (c,), dtype=jnp.float32),
            beta=0.1 * jax.random.normal(k1, (c,), dtype=jnp.float32),
            mean=0.1 * jax.random.normal(k2, (c,), dtype=jnp.float32),
            var=0.8 + 0.2 * jnp.abs(jax.random.normal(k3, (c,), dtype=jnp.float32)),
        )

    p = {
        # conv weights in HWIO layout (3, 3, cin, cout) == torch (co,ci,kh,kw)
        # rearranged; tap-major reshape to the matmul K axis is then free.
        'w1': w(ks[0], (3, 3, in_channels, out_channels)),
        'w2': w(ks[1], (3, 3, out_channels, out_channels), s=0.05),
        'bn1': bn(ks[2], out_channels),
        'bn2': bn(ks[3], out_channels),
        # SELayer Linear weights (bias=False):
        #   se_w1 = fc1.weight.T  -> (C, C//r);  se_w2 = fc2.weight -> (C, C//r)
        'se_w1': w(ks[4], (out_channels, cr), s=0.2),
        'se_w2': w(ks[5], (out_channels, cr), s=0.2),
    }
    if in_channels != out_channels:
        # nn.Conv2d(in, out, kernel_size=1): has a bias, no BN (as in the module).
        p['down_w'] = w(ks[6], (out_channels, in_channels))
        p['down_b'] = w(ks[7], (out_channels,), s=0.05)
    return p


def se_basic_block_reference(x_nchw, p, *, dilation=1):
    """Pure-JAX (XLA, f32) reference used to validate the fused Pallas kernel."""
    d = dilation
    hi = lax.Precision.HIGHEST

    def conv3x3(inp, w_hwio):
        return lax.conv_general_dilated(
            inp, w_hwio, window_strides=(1, 1), padding=[(d, d), (d, d)],
            rhs_dilation=(d, d), dimension_numbers=('NCHW', 'HWIO', 'NCHW'),
            precision=hi)

    def bn(t, b):
        s = b['gamma'] / jnp.sqrt(b['var'] + _BN_EPS)
        return t * s[None, :, None, None] + \
            (b['beta'] - b['mean'] * s)[None, :, None, None]

    out = jnp.clip(bn(conv3x3(x_nchw, p['w1']), p['bn1']), 0.0, 6.0)   # ReLU6
    out = bn(conv3x3(out, p['w2']), p['bn2'])

    pooled = out.mean(axis=(2, 3))                                     # (N, C)
    z = jnp.maximum(jnp.dot(pooled, p['se_w1'], precision=hi), 0.0)    # (N, Cr)
    gate = jax.nn.sigmoid(jnp.dot(z, p['se_w2'].T, precision=hi))      # (N, C)
    out = out * gate[:, :, None, None]

    if 'down_w' in p:
        res = jnp.einsum('oc,nchw->nohw', p['down_w'], x_nchw, precision=hi) \
            + p['down_b'][None, :, None, None]
    else:
        res = x_nchw
    return jnp.clip(out + res, 0.0, 6.0)


# ---------------------------------------------------------------------------
if __name__ == "__main__":
    key = jax.random.PRNGKey(0)
    k_x1, k_p1, k_x2, k_p2 = jax.random.split(key, 4)

    # Case 1: SEBasicBlock(16 -> 32), dilation 1: exercises the biased 1x1
    # downsample residual branch. N=4 gives the (N,)-grid pipeline real steps.
    N, in_ch, out_ch, H, W = 4, 16, 32, 16, 16
    x1 = jax.random.normal(k_x1, (N, in_ch, H, W), dtype=jnp.float32)
    p1 = init_se_basic_block(k_p1, in_ch, out_ch)
    fwd1 = jax.jit(functools.partial(se_basic_block_forward, dilation=1))
    y1 = jax.block_until_ready(fwd1(x1, p1))
    assert y1.shape == (N, out_ch, H, W), y1.shape
    assert bool(jnp.all(jnp.isfinite(y1)))
    assert bool(jnp.all(y1 >= 0.0)) and bool(jnp.all(y1 <= 6.0))   # final ReLU6
    err1 = float(jnp.max(jnp.abs(y1 - se_basic_block_reference(x1, p1, dilation=1))))
    assert err1 < 5e-2, f"case1 max |pallas - reference| = {err1}"

    # Case 2: SEBasicBlock(32 -> 32), dilation 2: exercises the identity
    # residual path and the dilated tap shifts/masks.
    x2 = jax.random.normal(k_x2, (2, out_ch, H, W), dtype=jnp.float32)
    p2 = init_se_basic_block(k_p2, out_ch, out_ch)
    fwd2 = jax.jit(functools.partial(se_basic_block_forward, dilation=2))
    y2 = jax.block_until_ready(fwd2(x2, p2))
    assert y2.shape == (2, out_ch, H, W), y2.shape
    err2 = float(jnp.max(jnp.abs(y2 - se_basic_block_reference(x2, p2, dilation=2))))
    assert err2 < 5e-2, f"case2 max |pallas - reference| = {err2}"

    print("KERNEL_OK")
</pallas_src>

<mosaic_0001>
module attributes {stable_mosaic.version = 11 : i64} {
  func.func @_se_basic_block_kernel(%arg0: i32, %arg1: memref<1x16x256xf32, #tpu.memory_space<vmem>>, %arg2: memref<2x256xbf16, #tpu.memory_space<vmem>>, %arg3: memref<32x144xbf16, #tpu.memory_space<vmem>>, %arg4: memref<32x1xf32, #tpu.memory_space<vmem>>, %arg5: memref<32x288xbf16, #tpu.memory_space<vmem>>, %arg6: memref<32x1xf32, #tpu.memory_space<vmem>>, %arg7: memref<32x2xf32, #tpu.memory_space<vmem>>, %arg8: memref<32x2xf32, #tpu.memory_space<vmem>>, %arg9: memref<32x16xf32, #tpu.memory_space<vmem>>, %arg10: memref<32x1xf32, #tpu.memory_space<vmem>>, %arg11: memref<1x32x256xf32, #tpu.memory_space<vmem>>) attributes {dimension_semantics = [#tpu.dimension_semantics<parallel>], iteration_bounds = array<i64: 4>, scalar_prefetch = 0 : i64, scratch_operands = 0 : i64, tpu.core_type = #tpu.core_type<tc>, window_params = [{transform_indices = @transform_0, window_bounds = array<i64: 1, 16, 256>}, {pipeline_mode = #tpu.pipeline_mode<synchronous>, transform_indices = @transform_1, window_bounds = array<i64: 2, 256>}, {pipeline_mode = #tpu.pipeline_mode<synchronous>, transform_indices = @transform_2, window_bounds = array<i64: 32, 144>}, {pipeline_mode = #tpu.pipeline_mode<synchronous>, transform_indices = @transform_3, window_bounds = array<i64: 32, 1>}, {pipeline_mode = #tpu.pipeline_mode<synchronous>, transform_indices = @transform_4, window_bounds = array<i64: 32, 288>}, {pipeline_mode = #tpu.pipeline_mode<synchronous>, transform_indices = @transform_5, window_bounds = array<i64: 32, 1>}, {pipeline_mode = #tpu.pipeline_mode<synchronous>, transform_indices = @transform_6, window_bounds = array<i64: 32, 2>}, {pipeline_mode = #tpu.pipeline_mode<synchronous>, transform_indices = @transform_7, window_bounds = array<i64: 32, 2>}, {pipeline_mode = #tpu.pipeline_mode<synchronous>, transform_indices = @transform_8, window_bounds = array<i64: 32, 16>}, {pipeline_mode = #tpu.pipeline_mode<synchronous>, transform_indices = @transform_9, window_bounds = array<i64: 32, 1>}, {transform_indices = @transform_10, window_bounds = array<i64: 1, 32, 256>}]} {
    %c0 = arith.constant 0 : index
    %c0_0 = arith.constant 0 : index
    %0 = vector.load %arg2[%c0, %c0_0] : memref<2x256xbf16, #tpu.memory_space<vmem>>, vector<1x256xbf16>
    %c1 = arith.constant 1 : index
    %c0_1 = arith.constant 0 : index
    %1 = vector.load %arg2[%c1, %c0_1] : memref<2x256xbf16, #tpu.memory_space<vmem>>, vector<1x256xbf16>
    %c0_2 = arith.constant 0 : index
    %c0_3 = arith.constant 0 : index
    %c0_4 = arith.constant 0 : index
    %2 = vector.load %arg1[%c0_2, %c0_3, %c0_4] : memref<1x16x256xf32, #tpu.memory_space<vmem>>, vector<1x16x256xf32>
    %3 = vector.shape_cast %2 : vector<1x16x256xf32> to vector<16x256xf32>
    %4 = arith.truncf %3 : vector<16x256xf32> to vector<16x256xbf16>
    %cst = arith.constant 0.000000e+00 : bf16
    %5 = vector.broadcast %cst : bf16 to vector<16x17xbf16>
    %6 = tpu.concatenate %5, %4, %5 in 1 : vector<16x17xbf16>, vector<16x256xbf16>, vector<16x17xbf16> -> vector<16x290xbf16>
    %7 = vector.extract_strided_slice %6 {offsets = [0, 0], sizes = [16, 256], strides = [1, 1]} : vector<16x290xbf16> to vector<16x256xbf16>
    %8 = vector.broadcast %0 : vector<1x256xbf16> to vector<16x256xbf16>
    %9 = arith.mulf %7, %8 : vector<16x256xbf16>
    %10 = vector.extract_strided_slice %6 {offsets = [0, 1], sizes = [16, 256], strides = [1, 1]} : vector<16x290xbf16> to vector<16x256xbf16>
    %11 = vector.extract_strided_slice %6 {offsets = [0, 2], sizes = [16, 256], strides = [1, 1]} : vector<16x290xbf16> to vector<16x256xbf16>
    %12 = vector.broadcast %1 : vector<1x256xbf16> to vector<16x256xbf16>
    %13 = arith.mulf %11, %12 : vector<16x256xbf16>
    %14 = vector.extract_strided_slice %6 {offsets = [0, 16], sizes = [16, 256], strides = [1, 1]} : vector<16x290xbf16> to vector<16x256xbf16>
    %15 = vector.broadcast %0 : vector<1x256xbf16> to vector<16x256xbf16>
    %16 = arith.mulf %14, %15 : vector<16x256xbf16>
    %17 = vector.extract_strided_slice %6 {offsets = [0, 17], sizes = [16, 256], strides = [1, 1]} : vector<16x290xbf16> to vector<16x256xbf16>
    %18 = vector.extract_strided_slice %6 {offsets = [0, 18], sizes = [16, 256], strides = [1, 1]} : vector<16x290xbf16> to vector<16x256xbf16>
    %19 = vector.broadcast %1 : vector<1x256xbf16> to vector<16x256xbf16>
    %20 = arith.mulf %18, %19 : vector<16x256xbf16>
    %21 = vector.extract_strided_slice %6 {offsets = [0, 32], sizes = [16, 256], strides = [1, 1]} : vector<16x290xbf16> to vector<16x256xbf16>
    %22 = vector.broadcast %0 : vector<1x256xbf16> to vector<16x256xbf16>
    %23 = arith.mulf %21, %22 : vector<16x256xbf16>
    %24 = vector.extract_strided_slice %6 {offsets = [0, 33], sizes = [16, 256], strides = [1, 1]} : vector<16x290xbf16> to vector<16x256xbf16>
    %25 = vector.extract_strided_slice %6 {offsets = [0, 34], sizes = [16, 256], strides = [1, 1]} : vector<16x290xbf16> to vector<16x256xbf16>
    %26 = vector.broadcast %1 : vector<1x256xbf16> to vector<16x256xbf16>
    %27 = arith.mulf %25, %26 : vector<16x256xbf16>
    %28 = tpu.concatenate %9, %10, %13, %16, %17, %20, %23, %24, %27 in 0 : vector<16x256xbf16>, vector<16x256xbf16>, vector<16x256xbf16>, vector<16x256xbf16>, vector<16x256xbf16>, vector<16x256xbf16>, vector<16x256xbf16>, vector<16x256xbf16>, vector<16x256xbf16> -> vector<144x256xbf16>
    %c0_5 = arith.constant 0 : index
    %c0_6 = arith.constant 0 : index
    %29 = vector.load %arg3[%c0_5, %c0_6] : memref<32x144xbf16, #tpu.memory_space<vmem>>, vector<32x144xbf16>
    %cst_7 = arith.constant dense<0.000000e+00> : vector<32x256xf32>
    %30 = tpu.matmul %29, %28, %cst_7 {dimension_numbers = #tpu.dot_dimension_numbers<[1], [0], [0], [1], [0, 0, 1, 1], [], []>} : vector<32x144xbf16>, vector<144x256xbf16>, vector<32x256xf32> -> vector<32x256xf32>
    %c0_8 = arith.constant 0 : index
    %c0_9 = arith.constant 0 : index
    %31 = vector.load %arg4[%c0_8, %c0_9] : memref<32x1xf32, #tpu.memory_space<vmem>>, vector<32x1xf32>
    %32 = vector.broadcast %31 : vector<32x1xf32> to vector<32x256xf32>
    %33 = arith.addf %30, %32 : vector<32x256xf32>
    %cst_10 = arith.constant 0.000000e+00 : f32
    %cst_11 = arith.constant 6.000000e+00 : f32
    %34 = vector.broadcast %cst_10 : f32 to vector<32x256xf32>
    %35 = arith.maximumf %34, %33 : vector<32x256xf32>
    %36 = vector.broadcast %cst_11 : f32 to vector<32x256xf32>
    %37 = arith.minimumf %36, %35 : vector<32x256xf32>
    %38 = arith.truncf %37 : vector<32x256xf32> to vector<32x256xbf16>
    %cst_12 = arith.constant 0.000000e+00 : bf16
    %39 = vector.broadcast %cst_12 : bf16 to vector<32x17xbf16>
    %40 = tpu.concatenate %39, %38, %39 in 1 : vector<32x17xbf16>, vector<32x256xbf16>, vector<32x17xbf16> -> vector<32x290xbf16>
    %41 = vector.extract_strided_slice %40 {offsets = [0, 0], sizes = [32, 256], strides = [1, 1]} : vector<32x290xbf16> to vector<32x256xbf16>
    %42 = vector.broadcast %0 : vector<1x256xbf16> to vector<32x256xbf16>
    %43 = arith.mulf %41, %42 : vector<32x256xbf16>
    %44 = vector.extract_strided_slice %40 {offsets = [0, 1], sizes = [32, 256], strides = [1, 1]} : vector<32x290xbf16> to vector<32x256xbf16>
    %45 = vector.extract_strided_slice %40 {offsets = [0, 2], sizes = [32, 256], strides = [1, 1]} : vector<32x290xbf16> to vector<32x256xbf16>
    %46 = vector.broadcast %1 : vector<1x256xbf16> to vector<32x256xbf16>
    %47 = arith.mulf %45, %46 : vector<32x256xbf16>
    %48 = vector.extract_strided_slice %40 {offsets = [0, 16], sizes = [32, 256], strides = [1, 1]} : vector<32x290xbf16> to vector<32x256xbf16>
    %49 = vector.broadcast %0 : vector<1x256xbf16> to vector<32x256xbf16>
    %50 = arith.mulf %48, %49 : vector<32x256xbf16>
    %51 = vector.extract_strided_slice %40 {offsets = [0, 17], sizes = [32, 256], strides = [1, 1]} : vector<32x290xbf16> to vector<32x256xbf16>
    %52 = vector.extract_strided_slice %40 {offsets = [0, 18], sizes = [32, 256], strides = [1, 1]} : vector<32x290xbf16> to vector<32x256xbf16>
    %53 = vector.broadcast %1 : vector<1x256xbf16> to vector<32x256xbf16>
    %54 = arith.mulf %52, %53 : vector<32x256xbf16>
    %55 = vector.extract_strided_slice %40 {offsets = [0, 32], sizes = [32, 256], strides = [1, 1]} : vector<32x290xbf16> to vector<32x256xbf16>
    %56 = vector.broadcast %0 : vector<1x256xbf16> to vector<32x256xbf16>
    %57 = arith.mulf %55, %56 : vector<32x256xbf16>
    %58 = vector.extract_strided_slice %40 {offsets = [0, 33], sizes = [32, 256], strides = [1, 1]} : vector<32x290xbf16> to vector<32x256xbf16>
    %59 = vector.extract_strided_slice %40 {offsets = [0, 34], sizes = [32, 256], strides = [1, 1]} : vector<32x290xbf16> to vector<32x256xbf16>
    %60 = vector.broadcast %1 : vector<1x256xbf16> to vector<32x256xbf16>
    %61 = arith.mulf %59, %60 : vector<32x256xbf16>
    %62 = tpu.concatenate %43, %44, %47, %50, %51, %54, %57, %58, %61 in 0 : vector<32x256xbf16>, vector<32x256xbf16>, vector<32x256xbf16>, vector<32x256xbf16>, vector<32x256xbf16>, vector<32x256xbf16>, vector<32x256xbf16>, vector<32x256xbf16>, vector<32x256xbf16> -> vector<288x256xbf16>
    %c0_13 = arith.constant 0 : index
    %c0_14 = arith.constant 0 : index
    %63 = vector.load %arg5[%c0_13, %c0_14] : memref<32x288xbf16, #tpu.memory_space<vmem>>, vector<32x288xbf16>
    %cst_15 = arith.constant dense<0.000000e+00> : vector<32x256xf32>
    %64 = tpu.matmul %63, %62, %cst_15 {dimension_numbers = #tpu.dot_dimension_numbers<[1], [0], [0], [1], [0, 0, 1, 1], [], []>} : vector<32x288xbf16>, vector<288x256xbf16>, vector<32x256xf32> -> vector<32x256xf32>
    %c0_16 = arith.constant 0 : index
    %c0_17 = arith.constant 0 : index
    %65 = vector.load %arg6[%c0_16, %c0_17] : memref<32x1xf32, #tpu.memory_space<vmem>>, vector<32x1xf32>
    %66 = vector.broadcast %65 : vector<32x1xf32> to vector<32x256xf32>
    %67 = arith.addf %64, %66 : vector<32x256xf32>
    %cst_18 = arith.constant dense<0.000000e+00> : vector<32xf32>
    %68 = vector.multi_reduction <add>, %67, %cst_18 [1] : vector<32x256xf32> to vector<32xf32>
    %69 = vector.shape_cast %68 : vector<32xf32> to vector<32x1xf32>
    %cst_19 = arith.constant 2.560000e+02 : f32
    %70 = vector.broadcast %cst_19 : f32 to vector<32x1xf32>
    %71 = arith.divf %69, %70 : vector<32x1xf32>
    %c0_20 = arith.constant 0 : index
    %c0_21 = arith.constant 0 : index
    %72 = vector.load %arg7[%c0_20, %c0_21] : memref<32x2xf32, #tpu.memory_space<vmem>>, vector<32x2xf32>
    %73 = vector.broadcast %71 : vector<32x1xf32> to vector<32x2xf32>
    %74 = arith.mulf %72, %73 : vector<32x2xf32>
    %cst_22 = arith.constant dense<0.000000e+00> : vector<2xf32>
    %75 = vector.multi_reduction <add>, %74, %cst_22 [0] : vector<32x2xf32> to vector<2xf32>
    %76 = vector.shape_cast %75 : vector<2xf32> to vector<1x2xf32>
    %cst_23 = arith.constant 0.000000e+00 : f32
    %77 = vector.broadcast %cst_23 : f32 to vector<1x2xf32>
    %78 = arith.maximumf %76, %77 : vector<1x2xf32>
    %c0_24 = arith.constant 0 : index
    %c0_25 = arith.constant 0 : index
    %79 = vector.load %arg8[%c0_24, %c0_25] : memref<32x2xf32, #tpu.memory_space<vmem>>, vector<32x2xf32>
    %80 = vector.broadcast %78 : vector<1x2xf32> to vector<32x2xf32>
    %81 = arith.mulf %79, %80 : vector<32x2xf32>
    %cst_26 = arith.constant dense<0.000000e+00> : vector<32xf32>
    %82 = vector.multi_reduction <add>, %81, %cst_26 [1] : vector<32x2xf32> to vector<32xf32>
    %83 = vector.shape_cast %82 : vector<32xf32> to vector<32x1xf32>
    %84 = arith.negf %83 : vector<32x1xf32>
    %85 = math.exp %84 : vector<32x1xf32>
    %cst_27 = arith.constant 1.000000e+00 : f32
    %86 = vector.broadcast %cst_27 : f32 to vector<32x1xf32>
    %87 = arith.addf %86, %85 : vector<32x1xf32>
    %88 = arith.divf %86, %87 : vector<32x1xf32>
    %c0_28 = arith.constant 0 : index
    %c0_29 = arith.constant 0 : index
    %89 = vector.load %arg9[%c0_28, %c0_29] : memref<32x16xf32, #tpu.memory_space<vmem>>, vector<32x16xf32>
    %cst_30 = arith.constant dense<0.000000e+00> : vector<32x256xf32>
    %90 = tpu.matmul %89, %3, %cst_30 {dimension_numbers = #tpu.dot_dimension_numbers<[1], [0], [0], [1], [0, 0, 1, 1], [], []>} : vector<32x16xf32>, vector<16x256xf32>, vector<32x256xf32> -> vector<32x256xf32>
    %c0_31 = arith.constant 0 : index
    %c0_32 = arith.constant 0 : index
    %91 = vector.load %arg10[%c0_31, %c0_32] : memref<32x1xf32, #tpu.memory_space<vmem>>, vector<32x1xf32>
    %92 = vector.broadcast %91 : vector<32x1xf32> to vector<32x256xf32>
    %93 = arith.addf %90, %92 : vector<32x256xf32>
    %94 = vector.broadcast %88 : vector<32x1xf32> to vector<32x256xf32>
    %95 = arith.mulf %67, %94 : vector<32x256xf32>
    %96 = arith.addf %95, %93 : vector<32x256xf32>
    %cst_33 = arith.constant 0.000000e+00 : f32
    %cst_34 = arith.constant 6.000000e+00 : f32
    %97 = vector.broadcast %cst_33 : f32 to vector<32x256xf32>
    %98 = arith.maximumf %97, %96 : vector<32x256xf32>
    %99 = vector.broadcast %cst_34 : f32 to vector<32x256xf32>
    %100 = arith.minimumf %99, %98 : vector<32x256xf32>
    %c0_35 = arith.constant 0 : index
    %c0_36 = arith.constant 0 : index
    %c0_37 = arith.constant 0 : index
    %101 = vector.load %arg11[%c0_35, %c0_36, %c0_37] : memref<1x32x256xf32, #tpu.memory_space<vmem>>, vector<1x32x256xf32>
    %102 = vector.shape_cast %101 : vector<1x32x256xf32> to vector<32x256xf32>
    %103 = vector.shape_cast %100 : vector<32x256xf32> to vector<1x32x256xf32>
    tpu.vector_store %arg11[%c0_35, %c0_36, %c0_37], %103 {strides = array<i32>} : memref<1x32x256xf32, #tpu.memory_space<vmem>>, vector<1x32x256xf32>,
    return
  }
  func.func @transform_0(%arg0: i32) -> (i32, i32, i32) {
    %c0_i32 = arith.constant 0 : i32
    %c0_i32_0 = arith.constant 0 : i32
    %c0_i32_1 = arith.constant 0 : i32
    return %arg0, %c0_i32, %c0_i32_0 : i32, i32, i32
  }
  func.func @transform_1(%arg0: i32) -> (i32, i32) {
    %c0_i32 = arith.constant 0 : i32
    %c0_i32_0 = arith.constant 0 : i32
    %c0_i32_1 = arith.constant 0 : i32
    return %c0_i32, %c0_i32_0 : i32, i32
  }
  func.func @transform_2(%arg0: i32) -> (i32, i32) {
    %c0_i32 = arith.constant 0 : i32
    %c0_i32_0 = arith.constant 0 : i32
    %c0_i32_1 = arith.constant 0 : i32
    return %c0_i32, %c0_i32_0 : i32, i32
  }
  func.func @transform_3(%arg0: i32) -> (i32, i32) {
    %c0_i32 = arith.constant 0 : i32
    %c0_i32_0 = arith.constant 0 : i32
    %c0_i32_1 = arith.constant 0 : i32
    return %c0_i32, %c0_i32_0 : i32, i32
  }
  func.func @transform_4(%arg0: i32) -> (i32, i32) {
    %c0_i32 = arith.constant 0 : i32
    %c0_i32_0 = arith.constant 0 : i32
    %c0_i32_1 = arith.constant 0 : i32
    return %c0_i32, %c0_i32_0 : i32, i32
  }
  func.func @transform_5(%arg0: i32) -> (i32, i32) {
    %c0_i32 = arith.constant 0 : i32
    %c0_i32_0 = arith.constant 0 : i32
    %c0_i32_1 = arith.constant 0 : i32
    return %c0_i32, %c0_i32_0 : i32, i32
  }
  func.func @transform_6(%arg0: i32) -> (i32, i32) {
    %c0_i32 = arith.constant 0 : i32
    %c0_i32_0 = arith.constant 0 : i32
    %c0_i32_1 = arith.constant 0 : i32
    return %c0_i32, %c0_i32_0 : i32, i32
  }
  func.func @transform_7(%arg0: i32) -> (i32, i32) {
    %c0_i32 = arith.constant 0 : i32
    %c0_i32_0 = arith.constant 0 : i32
    %c0_i32_1 = arith.constant 0 : i32
    return %c0_i32, %c0_i32_0 : i32, i32
  }
  func.func @transform_8(%arg0: i32) -> (i32, i32) {
    %c0_i32 = arith.constant 0 : i32
    %c0_i32_0 = arith.constant 0 : i32
    %c0_i32_1 = arith.constant 0 : i32
    return %c0_i32, %c0_i32_0 : i32, i32
  }
  func.func @transform_9(%arg0: i32) -> (i32, i32) {
    %c0_i32 = arith.constant 0 : i32
    %c0_i32_0 = arith.constant 0 : i32
    %c0_i32_1 = arith.constant 0 : i32
    return %c0_i32, %c0_i32_0 : i32, i32
  }
  func.func @transform_10(%arg0: i32) -> (i32, i32, i32) {
    %c0_i32 = arith.constant 0 : i32
    %c0_i32_0 = arith.constant 0 : i32
    %c0_i32_1 = arith.constant 0 : i32
    return %arg0, %c0_i32, %c0_i32_0 : i32, i32, i32
  }
}

</mosaic_0001>

<bundles_post_ra>
// kernel: se_basic_block_forward.1
= control target key start
LH: loop header
LB: loop body
LE: loop exit
PB: predicated region body
PF: predicated region fallthrough
CT: control target
= control target key end

     0   :  { %s1665_s13 = smov 0   ;;  %s2196_s0 = inlined_call_operand.vmem [shape: f32[4,16,256], index: 0, kind: input, shape index: {}]   ;;  %s2197_s1 = inlined_call_operand.vmem [shape: bf16[2,256], index: 1, kind: input, shape index: {}]   ;;  %s2198_s2 = inlined_call_operand.vmem [shape: bf16[32,144], index: 2, kind: input, shape index: {}]   ;;  %s2199_s3 = inlined_call_operand.vmem [shape: f32[32,1], index: 3, kind: input, shape index: {}]   ;;  %s2200_s4 = inlined_call_operand.vmem [shape: bf16[32,288], index: 4, kind: input, shape index: {}]   ;;  %s2201_s5 = inlined_call_operand.vmem [shape: f32[32,1], index: 5, kind: input, shape index: {}]   ;;  %s2202_s6 = inlined_call_operand.vmem [shape: f32[32,2], index: 6, kind: input, shape index: {}]   ;;  %s2203_s7 = inlined_call_operand.vmem [shape: f32[32,2], index: 7, kind: input, shape index: {}]   ;;  %s2204_s8 = inlined_call_operand.vmem [shape: f32[32,16], index: 8, kind: input, shape index: {}]   ;;  %s2205_s9 = inlined_call_operand.vmem [shape: f32[32,1], index: 9, kind: input, shape index: {}]   ;;  %s2206_s10 = inlined_call_operand.vmem [shape: f32[4,32,256], index: 10, kind: output, shape index: {}]  }
   0x1 LB: > { %s1472_s14 = sadd.s32 4294967295, %s1591_s13   ;;  %p1476_p0 = scmp.ge.s32.totalorder %s1591_s13, 1  ;;  %s1591_s13 = sphi %s1665_s13, %s20_s13  }
   0x2   : > { %p312_p1 = scmp.lt.s32.totalorder %s1591_s13, 5 }
   0x4   : > { %p313_p2 = pnand %p1476_p0, %p312_p1 }
   0x5   : > { %p350_p3 = scmp.lt.s32.totalorder (!%p313_p2), %s1472_s14, 3  ;;  %v397_v0 = vlaneseq (!%p313_p2)  ;;  %v1481_v1 = vld.sshfl [vmem:[%s2197_s1] sm:$0x11 pattern:$0x75316420] (!%p313_p2)  ;;  %s1594_s21 = smov (!%p313_p2), 17  }
   0x6   : > { %316 = sbr.rel (%p313_p2) target bundleno = 1476 (0x5c4), region = 60  ;;  %v1593_v2 = vmov (!%p313_p2), 1966171168   ;;  %v393_v6 = vcombine.high (!%p313_p2), %v1481_v1, %v1481_v1  ;;  %s1595_s22 = smov (!%p313_p2), 2   ;;  %vm374_vm0 = vcmask (!%p313_p2), 138240   ;;  %vm458_vm1 = vcmask (!%p313_p2), 130048  }
   0x7   : > { %v395_v3 = vunpack.c.l.s4 (!%p313_p2), %v1593_v2  ;;  %v398_v4 = vshrl.u32 (!%p313_p2), %v397_v0, 7  ;;  %s1596_s23 = smov (!%p313_p2), 16   ;;  %s1597_s24 = smov (!%p313_p2), 18   ;;  %vm444_vm2 = vcmask (!%p313_p2), 15360   ;;  %vm482_vm3 = vcmask (!%p313_p2), 261120  }
   0x8   : > { %s1598_s25 = smov (!%p313_p2), 32   ;;  %s1599_s26 = smov (!%p313_p2), 34   ;;  %vm470_vm4 = vcmask (!%p313_p2), 146432   ;;  %vm494_vm5 = vcmask (!%p313_p2), 277504   ;;  %v1557_v59 = vld [vmem:[%s2198_s2 + $0x4] ss:$8 sps:$4 sm:$0xff] (!%p313_p2)  }
   0x9   : > { %v396_v5 = vunpack.c.0.s8 (!%p313_p2), %v395_v3  ;;  %v413_v16 = vsub.s32 (!%p313_p2), 0, %v398_v4  ;;  %s1600_s27 = smov (!%p313_p2), 127   ;;  %s1601_s28 = smov (!%p313_p2), 111   ;;  %1486 = vmatprep.mubr.msk.bf16.mxu0 (!%p313_p2), %vm458_vm1, %v1557_v59  ;;  %v1608_v2 = vmov (!%p313_p2), 0   ;;  %v612_v3 = vld [vmem:[%s2199_s3 + $0x8] sm:$0xff] (!%p313_p2)  ;;  %vm510_vm6 = vcmask (!%p313_p2), 1039360  }
   0xa   : > { %s1602_s29 = smov (!%p313_p2), 112   ;;  %s1603_s30 = smov (!%p313_p2), 126   ;;  %1553 = vset.pattern.permute.xlu0 (!%p313_p2), %v1608_v2  ;;  %1554 = vset.pattern.permute.xlu1 (!%p313_p2), %v1608_v2  ;;  %vm524_vm7 = vcmask (!%p313_p2), 1031168   ;;  %vm538_vm8 = vcmask (!%p313_p2), 916480   ;;  %vm549_vm9 = vcmask (!%p313_p2), 908288   ;;  %vm563_vm10 = vcmask (!%p313_p2), 900096  }
   0xb   : > { %v399_v10 = vsub.s32 (!%p313_p2), %v396_v5, %v398_v4  ;;  %s1604_s11 = smov (!%p313_p2), 110   ;;  %s1605_s12 = smov (!%p313_p2), 96   ;;  %v614_v4 = vld [vmem:[%s2199_s3 + $0x18] sm:$0xff] (!%p313_p2)  ;;  %v613_v5 = vld [vmem:[%s2199_s3 + $0x10] sm:$0xff] (!%p313_p2)  ;;  %vm577_vm11 = vcmask (!%p313_p2), 785408   ;;  %vm588_vm12 = vcmask (!%p313_p2), 777216  }
   0xc   : > { %s1606_s15 = smov (!%p313_p2), 95   ;;  %s1607_s18 = smov (!%p313_p2), 94   ;;  %vm602_vm13 = vcmask (!%p313_p2), 769024  }
   0xd   : > { %s2208_s14 = smov (!%p350_p3, %s1472_s14), 3  ;;  %v400_v13 = vrot.slane %v1481_v1, %v399_v10  ;;  %v407_v14 = vrot.slane %v393_v6, %v399_v10  ;;  %v611_v1 = vld [vmem:[%s2199_s3] sm:$0xff] }
   0xe   : > { %s1506_s17 = sshll.u32 %s2208_s14, 5 }
   0xf   : > { %s354_s20 = scalar_lea.vmem %s2196_s0, %s1506_s17  ;;  %v424_v17 = vshrl.u32 %v400_v13, 16  ;;  %v409_v18 = vpack.i.b16 %v400_v13, %v400_v13  ;;  %v431_v19 = vshrl.u32 %v407_v14, 16  ;;  %v416_v25 = vpack.i.b16 %v407_v14, %v407_v14 }
  0x10   : > { %v362_v7 = vld [vmem:[%s354_s20] sm:$0xff]  ;;  %v364_v8 = vld [vmem:[%s354_s20 + $0x10] sm:$0xff]  ;;  %v363_v9 = vld [vmem:[%s354_s20 + $0x8] sm:$0xff] }
  0x11   : > { %v1682_v11 = vpack.c.bf16 %v364_v8, %v362_v7  ;;  %v365_v12 = vld [vmem:[%s354_s20 + $0x18] sm:$0xff]  ;;  %v425_v20 = vpack.i.b16 %v424_v17, %v424_v17  ;;  %v432_v21 = vpack.i.b16 %v431_v19, %v431_v19  ;;  %v1690_v22 = vrot.slane %v409_v18, %v413_v16 }
  0x12   : > { %v1686_v15 = vpack.c.bf16 %v365_v12, %v363_v9  ;;  %v1693_v26 = vrot.slane %v416_v25, %v413_v16 }
  0x13   : > { %370 = vrot.lane.b32.xlu0 %v1682_v11, %s1594_s21  ;;  %v430_v23 = vrot.slane %v425_v20, %v413_v16  ;;  %v437_v24 = vrot.slane %v432_v21, %v413_v16 }
  0x15   : > { %440 = vrot.lane.b32.xlu1 %v430_v23, %s1595_s22 }
  0x17   : > { %372 = vrot.lane.b32.xlu0 %v1686_v15, %s1594_s21 }
  0x19   : > { %442 = vrot.lane.b32.xlu1 %v437_v24, %s1595_s22 }
  0x1b   : > { %454 = vrot.lane.b32.xlu0 %v1690_v22, %s1596_s23 }
  0x1d   : > { %456 = vrot.lane.b32.xlu1 %v1693_v26, %s1596_s23  ;;  %s1507_s23 = sshll.u32 %s2208_s14, 6 }
  0x1f   : > { %466 = vrot.lane.b32.xlu0 %v430_v23, %s1597_s24 }
  0x21   : > { %468 = vrot.lane.b32.xlu1 %v437_v24, %s1597_s24 }
  0x23   : > { %478 = vrot.lane.b32.xlu0 %v1690_v22, %s1598_s25 }
  0x25   : > { %480 = vrot.lane.b32.xlu1 %v1693_v26, %s1598_s25 }
  0x27   : > { %490 = vrot.lane.b32.xlu0 %v430_v23, %s1599_s26 }
  0x29   : > { %492 = vrot.lane.b32.xlu1 %v437_v24, %s1599_s26 }
  0x85   : > { %v371_v27 = vpop.permute.xlu0 %370 }
  0x86   : > { %v1699_v28 = vsel %vm374_vm0, 0, %v371_v27 }
  0x87   : > { %v1713_v33 = vpop.permute.xlu1 %440  ;;  %v422_v34 = vmul.bf16 %v1690_v22, %v1699_v28 }
  0x88   : > { %v449_v41 = vmul.bf16 %v1713_v33, %v1699_v28 }
  0x89   : > { %v373_v29 = vpop.permute.xlu0 %372 }
  0x8a   : > { %v1702_v30 = vsel %vm374_vm0, %v371_v27, %v373_v29  ;;  %v1705_v31 = vsel %vm374_vm0, %v373_v29, 0 }
  0x8b   : > { %508 = vrot.lane.b32.xlu1 %v1705_v31, %s1600_s27  ;;  %506 = vrot.lane.b32.xlu0 %v1702_v30, %s1600_s27  ;;  %v423_v32 = vmul.bf16 %v1693_v26, %v1702_v30  ;;  %v1721_v35 = vpop.permute.xlu1 %442 }
  0x8c   : > { %v1747_v43 = vsel %vm444_vm2, %v1713_v33, %v1721_v35  ;;  %v451_v46 = vmul.bf16 %v1721_v35, %v1705_v31 }
  0x8d   : > { %660 = vmatprep.subr.bf16.mxu0 %v423_v32  ;;  %v1723_v36 = vpop.permute.xlu0 %454  ;;  %v450_v45 = vmul.bf16 %v1747_v43, %v1702_v30 }
  0x8e   : > { %661 = vmatpush1.bf16.msra.mxu0 %v422_v34  ;;  %v463_v39 = vmul.bf16 %v1723_v36, %v1699_v28 }
  0x8f   : > { %545 = vrot.lane.b32.xlu1 %v1702_v30, %s1601_s28  ;;  %504 = vrot.lane.b32.xlu0 %v1699_v28, %s1600_s27  ;;  %v1727_v37 = vpop.permute.xlu1 %456 }
  0x90   : > { %v465_v38 = vmul.bf16 %v1727_v37, %v1705_v31  ;;  %v1736_v40 = vsel %vm458_vm1, %v1723_v36, %v1727_v37 }
  0x91   : > { %v464_v42 = vmul.bf16 %v1736_v40, %v1702_v30  ;;  %v1757_v47 = vpop.permute.xlu0 %466 }
  0x92   : > { %v475_v48 = vmul.bf16 %v1757_v47, %v1699_v28 }
  0x93   : > { %547 = vrot.lane.b32.xlu0 %v1705_v31, %s1601_s28  ;;  %536 = vrot.lane.b32.xlu1 %v465_v38, %s1602_s29  ;;  %v1751_v44 = vpop.permute.xlu1 %468 }
  0x94   : > { %v477_v51 = vmul.bf16 %v1751_v44, %v1705_v31  ;;  %v1781_v54 = vsel %vm470_vm4, %v1757_v47, %v1751_v44 }
  0x95   : > { %v1768_v50 = vpop.permute.xlu0 %478  ;;  %v476_v56 = vmul.bf16 %v1781_v54, %v1702_v30 }
  0x96   : > { %v487_v57 = vmul.bf16 %v1768_v50, %v1699_v28 }
  0x97   : > { %532 = vrot.lane.b32.xlu0 %v463_v39, %s1602_s29  ;;  %518 = vrot.lane.b32.xlu1 %v449_v41, %s1603_s30  ;;  %v1763_v49 = vpop.permute.xlu1 %480 }
  0x98   : > { %v489_v52 = vmul.bf16 %v1763_v49, %v1705_v31  ;;  %v1777_v53 = vsel %vm482_vm3, %v1768_v50, %v1763_v49 }
  0x99   : > { %v488_v55 = vmul.bf16 %v1777_v53, %v1702_v30  ;;  %v1801_v60 = vpop.permute.xlu0 %490 }
  0x9a   : > { %v499_v0 = vmul.bf16 %v1801_v60, %v1699_v28 }
  0x9b   : > { %534 = vrot.lane.b32.xlu0 %v464_v42, %s1602_s29  ;;  %520 = vrot.lane.b32.xlu1 %v450_v45, %s1603_s30  ;;  %v1793_v58 = vpop.permute.xlu1 %492 }
  0x9c   : > { %v1806_v61 = vsel %vm494_vm5, %v1801_v60, %v1793_v58  ;;  %v501_v63 = vmul.bf16 %v1793_v58, %v1705_v31 }
  0x9d   : > { %v500_v62 = vmul.bf16 %v1806_v61, %v1702_v30 }
  0x9f   : > { %522 = vrot.lane.b32.xlu0 %v451_v46, %s1603_s30  ;;  %543 = vrot.lane.b32.xlu1 %v1699_v28, %s1601_s28 }
  0xa3   : > { %557 = vrot.lane.b32.xlu0 %v475_v48, %s1604_s11  ;;  %561 = vrot.lane.b32.xlu1 %v477_v51, %s1604_s11 }
  0xa7   : > { %575 = vrot.lane.b32.xlu0 %v489_v52, %s1605_s12  ;;  %573 = vrot.lane.b32.xlu1 %v488_v55, %s1605_s12 }
  0xab   : > { %559 = vrot.lane.b32.xlu0 %v476_v56, %s1604_s11  ;;  %571 = vrot.lane.b32.xlu1 %v487_v57, %s1605_s12 }
  0xaf   : > { %584 = vrot.lane.b32.xlu0 %v1702_v30, %s1606_s15  ;;  %586 = vrot.lane.b32.xlu1 %v1705_v31, %s1606_s15 }
  0xb3   : > { %582 = vrot.lane.b32.xlu0 %v1699_v28, %s1606_s15  ;;  %598 = vrot.lane.b32.xlu1 %v500_v62, %s1607_s18 }
  0xb7   : > { %600 = vrot.lane.b32.xlu0 %v501_v63, %s1607_s18  ;;  %596 = vrot.lane.b32.xlu1 %v499_v0, %s1607_s18 }
  0xbb   : > { %617 = vperm.xlu0 %1553, %v611_v1   ;;  %622 = vperm.xlu1 %1554, %v612_v3   ;;  %v1555_v1 = vld [vmem:[%s2198_s2] ss:$8 sps:$4 sm:$0xff]   ;;  %v1558_v3 = vld [vmem:[%s2198_s2 + $0x14] ss:$8 sps:$4 sm:$0xff]  }
  0xbf   : > { %632 = vperm.xlu0 %1553, %v614_v4   ;;  %627 = vperm.xlu1 %1554, %v613_v5   ;;  %v1560_v4 = vld [vmem:[%s2198_s2 + $0x10] ss:$8 sps:$4 sm:$0xff]  }
  0xfd   : > { %v509_v6 = vpop.permute.xlu1 %508  ;;  %v507_v7 = vpop.permute.xlu0 %506 }
  0xfe   : > { %v512_v8 = vsel %vm510_vm6, %v507_v7, %v509_v6 }
  0xff   : > { %662 = vmatprep.subr.bf16.mxu0 %v512_v8 }
 0x101   : > { %v505_v9 = vpop.permute.xlu0 %504  ;;  %v546_v12 = vpop.permute.xlu1 %545 }
 0x102   : > { %v511_v10 = vsel %vm510_vm6, %v505_v9, %v507_v7 }
 0x103   : > { %663 = vmatpush1.bf16.msra.mxu0 %v511_v10 }
 0x105   : > { %v548_v13 = vpop.permute.xlu0 %547  ;;  %v537_v14 = vpop.permute.xlu1 %536 }
 0x106   : > { %v551_v29 = vsel %vm549_vm9, %v546_v12, %v548_v13 }
 0x109   : > { %v533_v16 = vpop.permute.xlu0 %532  ;;  %v519_v17 = vpop.permute.xlu1 %518 }
 0x10d   : > { %v535_v18 = vpop.permute.xlu0 %534  ;;  %v521_v19 = vpop.permute.xlu1 %520 }
 0x10e   : > { %v525_v23 = vsel %vm524_vm7, %v519_v17, %v521_v19  ;;  %v540_v24 = vsel %vm538_vm8, %v535_v18, %v537_v14  ;;  %v539_v28 = vsel %vm538_vm8, %v533_v16, %v535_v18 }
 0x111   : > { %v523_v20 = vpop.permute.xlu0 %522  ;;  %v544_v25 = vpop.permute.xlu1 %543 }
 0x112   : > { %v526_v21 = vsel %vm524_vm7, %v521_v19, %v523_v20  ;;  %v550_v32 = vsel %vm549_vm9, %v544_v25, %v546_v12 }
 0x113   : > { %664 = vmatprep.subr.bf16.mxu0 %v526_v21 }
 0x114   : > { %665 = vmatpush1.bf16.msra.mxu0 %v525_v23 }
 0x115   : > { %666 = vmatprep.subr.bf16.mxu0 %v540_v24  ;;  %v558_v27 = vpop.permute.xlu0 %557  ;;  %v562_v30 = vpop.permute.xlu1 %561 }
 0x118   : > { %667 = vmatpush1.bf16.msra.mxu0 %v539_v28 }
 0x119   : > { %668 = vmatprep.subr.bf16.mxu0 %v551_v29  ;;  %v576_v31 = vpop.permute.xlu0 %575  ;;  %v574_v34 = vpop.permute.xlu1 %573 }
 0x11a   : > { %v579_v42 = vsel %vm577_vm11, %v574_v34, %v576_v31 }
 0x11c   : > { %669 = vmatpush1.bf16.msra.mxu0 %v550_v32 }
 0x11d   : > { %v560_v38 = vpop.permute.xlu0 %559  ;;  %v572_v45 = vpop.permute.xlu1 %571 }
 0x11e   : > { %v565_v39 = vsel %vm563_vm10, %v560_v38, %v562_v30  ;;  %v564_v41 = vsel %vm563_vm10, %v558_v27, %v560_v38  ;;  %v578_v48 = vsel %vm577_vm11, %v572_v45, %v574_v34 }
 0x11f   : > { %670 = vmatprep.subr.bf16.mxu0 %v565_v39 }
 0x120   : > { %671 = vmatpush1.bf16.msra.mxu0 %v564_v41 }
 0x121   : > { %672 = vmatprep.subr.bf16.mxu0 %v579_v42  ;;  %v585_v46 = vpop.permute.xlu0 %584  ;;  %v587_v51 = vpop.permute.xlu1 %586 }
 0x122   : > { %v590_v55 = vsel %vm588_vm12, %v585_v46, %v587_v51 }
 0x124   : > { %673 = vmatpush1.bf16.msra.mxu0 %v578_v48 }
 0x125   : > { %v583_v52 = vpop.permute.xlu0 %582  ;;  %674 = vmatprep.subr.bf16.mxu0 %v590_v55  ;;  %v599_v57 = vpop.permute.xlu1 %598 }
 0x126   : > { %v589_v56 = vsel %vm588_vm12, %v583_v52, %v585_v46 }
 0x128   : > { %675 = vmatpush1.bf16.msra.mxu0 %v589_v56 }
 0x129   : > { %v601_v59 = vpop.permute.xlu0 %600  ;;  %v597_v63 = vpop.permute.xlu1 %596 }
 0x12a   : > { %v604_v62 = vsel %vm602_vm13, %v599_v57, %v601_v59  ;;  %v603_v0 = vsel %vm602_vm13, %v597_v63, %v599_v57 }
 0x12b   : > { %676 = vmatprep.subr.bf16.mxu0 %v604_v62 }
 0x12c   : > { %677 = vmatpush1.bf16.msra.mxu0 %v603_v0 }
 0x12f   : > { %693 = vmatmul.mubr.bf16.vlgmr.msra.gmra.mrb[0].mxu0 %v1555_v1 }
 0x130   : > { %1487 = vmatprep.mubr.msk.bf16.mxu0 %vm458_vm1, %v1558_v3 }
 0x137   : > { %703 = vmatmul.mubr.bf16.gmra.mrb[4].mxu0 %v1560_v4 }
 0x138   : > { %1143 = vmatprep.mubr.bf16.mxu0 %v1608_v2 }
 0x13a   : > { %v618_v5 = vpop.permute.xlu0 %617  ;;  %v623_v9 = vpop.permute.xlu1 %622 }
 0x13e   : > { %v628_v25 = vpop.permute.xlu1 %627  ;;  %v633_v32 = vpop.permute.xlu0 %632 }
 0x202   : > { %v694_v6 = vpop.f32.mrb[0].mxu0 }
 0x203   : > { %v695_v7 = vadd.f32 %v694_v6, %v618_v5  ;;  %v696_v8 = vpop.f32.mrb[1].mxu0 }
 0x204   : > { %v697_v10 = vadd.f32 %v696_v8, %v618_v5  ;;  %v698_v12 = vpop.f32.mrb[2].mxu0 }
 0x205   : > { %v713_v13 = vmax.f32 %v695_v7, 0.0  ;;  %v699_v14 = vadd.f32 %v698_v12, %v623_v9  ;;  %v700_v16 = vpop.f32.mrb[3].mxu0 }
 0x206   : > { %v714_v17 = vmax.f32 %v697_v10, 0.0  ;;  %v701_v18 = vadd.f32 %v700_v16, %v623_v9 }
 0x207   : > { %v715_v19 = vmax.f32 %v699_v14, 0.0  ;;  %v721_v21 = vmin.f32 %v713_v13, 6.0 }
 0x208   : > { %v716_v20 = vmax.f32 %v701_v18, 0.0  ;;  %v722_v24 = vmin.f32 %v714_v17, 6.0 }
 0x209   : > { %v723_v23 = vmin.f32 %v715_v19, 6.0 }
 0x20a   : > { %v724_v27 = vmin.f32 %v716_v20, 6.0  ;;  %v704_v28 = vpop.f32.mrb[4].mxu0 }
 0x20b   : > { %v729_v29 = vpack.c.bf16 %v723_v23, %v721_v21  ;;  %v705_v30 = vadd.f32 %v704_v28, %v628_v25  ;;  %v706_v31 = vpop.f32.mrb[5].mxu0 }
 0x20c   : > { %v730_v34 = vpack.c.bf16 %v724_v27, %v722_v24  ;;  %v707_v38 = vadd.f32 %v706_v31, %v628_v25  ;;  %v708_v39 = vpop.f32.mrb[6].mxu0 }
 0x20d   : > { %v717_v41 = vmax.f32 %v705_v30, 0.0  ;;  %v709_v42 = vadd.f32 %v708_v39, %v633_v32  ;;  %v710_v45 = vpop.f32.mrb[7].mxu0  ;;  %737 = vrot.lane.b32.xlu1 %v729_v29, %s1594_s21 }
 0x20e   : > { %v718_v46 = vmax.f32 %v707_v38, 0.0  ;;  %v711_v48 = vadd.f32 %v710_v45, %v633_v32  ;;  %739 = vrot.lane.b32.xlu0 %v730_v34, %s1594_s21 }
 0x20f   : > { %v719_v51 = vmax.f32 %v709_v42, 0.0  ;;  %v725_v55 = vmin.f32 %v717_v41, 6.0  ;;  %v997_v41 = vld [vmem:[%s2201_s5] sm:$0xff] }
 0x210   : > { %v720_v52 = vmax.f32 %v711_v48, 0.0  ;;  %v726_v57 = vmin.f32 %v718_v46, 6.0 }
 0x211   : > { %v727_v56 = vmin.f32 %v719_v51, 6.0 }
 0x212   : > { %v728_v59 = vmin.f32 %v720_v52, 6.0 }
 0x213   : > { %v731_v62 = vpack.c.bf16 %v727_v56, %v725_v55 }
 0x214   : > { %v732_v63 = vpack.c.bf16 %v728_v59, %v726_v57 }
 0x215   : > { %741 = vrot.lane.b32.xlu1 %v731_v62, %s1594_s21 }
 0x216   : > { %743 = vrot.lane.b32.xlu0 %v732_v63, %s1594_s21 }
 0x27f   : > { %v738_v0 = vpop.permute.xlu1 %737 }
 0x280   : > { %v1867_v1 = vsel %vm374_vm0, 0, %v738_v0  ;;  %v740_v3 = vpop.permute.xlu0 %739 }
 0x281   : > { %v1870_v4 = vsel %vm374_vm0, %v738_v0, %v740_v3  ;;  %v1873_v5 = vsel %vm374_vm0, %v740_v3, 0  ;;  %799 = vrot.lane.b32.xlu1 %v1867_v1, %s1600_s27  ;;  %v761_v7 = vmul.bf16 %v1867_v1, %v1690_v22  ;;  %v765_v18 = vmul.bf16 %v1867_v1, %v1713_v33 }
 0x282   : > { %803 = vrot.lane.b32.xlu0 %v1873_v5, %s1600_s27  ;;  %v762_v6 = vmul.bf16 %v1870_v4, %v1693_v26  ;;  %v767_v12 = vmul.bf16 %v1873_v5, %v1721_v35  ;;  %v773_v17 = vmul.bf16 %v1873_v5, %v1727_v37  ;;  %v779_v19 = vmul.bf16 %v1873_v5, %v1751_v44 }
 0x283   : > { %v766_v20 = vmul.bf16 %v1870_v4, %v1747_v43  ;;  %v772_v21 = vmul.bf16 %v1870_v4, %v1736_v40  ;;  %v778_v23 = vmul.bf16 %v1870_v4, %v1781_v54  ;;  %v785_v30 = vmul.bf16 %v1873_v5, %v1763_v49 }
 0x284   : > { %1058 = vmatprep.subr.bf16.mxu1 %v762_v6  ;;  %v791_v32 = vmul.bf16 %v1873_v5, %v1793_v58  ;;  %v789_v34 = vmul.bf16 %v1867_v1, %v1801_v60 }
 0x285   : > { %871 = vrot.lane.b32.xlu1 %v1867_v1, %s1601_s28  ;;  %1059 = vmatpush1.bf16.msra.mxu1 %v761_v7 }
 0x286   : > { %875 = vrot.lane.b32.xlu0 %v1873_v5, %s1601_s28 }
 0x287   : > { %v742_v8 = vpop.permute.xlu1 %741 }
 0x288   : > { %v1888_v9 = vsel %vm374_vm0, 0, %v742_v8  ;;  %v744_v10 = vpop.permute.xlu0 %743 }
 0x289   : > { %v1893_v13 = vsel %vm374_vm0, %v742_v8, %v744_v10  ;;  %801 = vrot.lane.b32.xlu1 %v1870_v4, %s1600_s27  ;;  %v763_v16 = vmul.bf16 %v1888_v9, %v1690_v22  ;;  %v771_v22 = vmul.bf16 %v1867_v1, %v1723_v36  ;;  %v768_v24 = vmul.bf16 %v1888_v9, %v1713_v33 }
 0x28a   : > { %829 = vrot.lane.b32.xlu0 %v767_v12, %s1603_s30  ;;  %v764_v14 = vmul.bf16 %v1893_v13, %v1693_v26  ;;  %v777_v26 = vmul.bf16 %v1867_v1, %v1757_v47  ;;  %v759_v25 = vsel %vm374_vm0, %v744_v10, 0  ;;  %v774_v27 = vmul.bf16 %v1888_v9, %v1723_v36 }
 0x28b   : > { %v780_v28 = vmul.bf16 %v1888_v9, %v1757_v47  ;;  %v770_v33 = vmul.bf16 %v759_v25, %v1721_v35  ;;  %v769_v29 = vmul.bf16 %v1893_v13, %v1747_v43  ;;  %v784_v36 = vmul.bf16 %v1870_v4, %v1777_v53 }
 0x28c   : > { %1060 = vmatprep.subr.bf16.mxu1 %v764_v14  ;;  %v776_v47 = vmul.bf16 %v759_v25, %v1727_v37  ;;  %v775_v35 = vmul.bf16 %v1893_v13, %v1736_v40  ;;  %v783_v43 = vmul.bf16 %v1867_v1, %v1768_v50  ;;  %v786_v31 = vmul.bf16 %v1888_v9, %v1768_v50 }
 0x28d   : > { %873 = vrot.lane.b32.xlu1 %v1870_v4, %s1601_s28  ;;  %1061 = vmatpush1.bf16.msra.mxu1 %v763_v16  ;;  %v790_v37 = vmul.bf16 %v1870_v4, %v1806_v61  ;;  %v782_v40 = vmul.bf16 %v759_v25, %v1751_v44  ;;  %v781_v50 = vmul.bf16 %v1893_v13, %v1781_v54  ;;  %v1563_v54 = vld [vmem:[%s2200_s4 + $0x4] ss:$12 sps:$4 sm:$0xff]  }
 0x28e   : > { %855 = vrot.lane.b32.xlu0 %v773_v17, %s1602_s29  ;;  %v788_v38 = vmul.bf16 %v759_v25, %v1763_v49  ;;  %v787_v44 = vmul.bf16 %v1893_v13, %v1777_v53  ;;  %1090 = vmatprep.mubr.bf16.mxu1 %v1563_v54  ;;  %v793_v49 = vmul.bf16 %v1893_v13, %v1806_v61  ;;  %v998_v61 = vld [vmem:[%s2201_s5 + $0x8] sm:$0xff] }
 0x28f   : > { %v794_v53 = vmul.bf16 %v759_v25, %v1793_v58  ;;  %v792_v39 = vmul.bf16 %v1888_v9, %v1801_v60  ;;  %v999_v58 = vld [vmem:[%s2201_s5 + $0x10] sm:$0xff]  ;;  %v1000_v60 = vld [vmem:[%s2201_s5 + $0x18] sm:$0xff] }
 0x291   : > { %825 = vrot.lane.b32.xlu1 %v765_v18, %s1603_s30 }
 0x292   : > { %901 = vrot.lane.b32.xlu0 %v779_v19, %s1604_s11 }
 0x295   : > { %851 = vrot.lane.b32.xlu1 %v771_v22, %s1602_s29 }
 0x296   : > { %805 = vrot.lane.b32.xlu0 %v1888_v9, %s1600_s27 }
 0x299   : > { %897 = vrot.lane.b32.xlu1 %v777_v26, %s1604_s11 }
 0x29a   : > { %877 = vrot.lane.b32.xlu0 %v1888_v9, %s1601_s28 }
 0x29d   : > { %827 = vrot.lane.b32.xlu1 %v766_v20, %s1603_s30 }
 0x29e   : > { %807 = vrot.lane.b32.xlu0 %v1893_v13, %s1600_s27 }
 0x2a1   : > { %853 = vrot.lane.b32.xlu1 %v772_v21, %s1602_s29 }
 0x2a2   : > { %879 = vrot.lane.b32.xlu0 %v1893_v13, %s1601_s28 }
 0x2a5   : > { %899 = vrot.lane.b32.xlu1 %v778_v23, %s1604_s11 }
 0x2a6   : > { %831 = vrot.lane.b32.xlu0 %v768_v24, %s1603_s30 }
 0x2a9   : > { %809 = vrot.lane.b32.xlu1 %v759_v25, %s1600_s27  ;;  %s2175_s27 = scalar_lea.vmem %s2206_s10, %s1507_s23 }
 0x2aa   : > { %857 = vrot.lane.b32.xlu0 %v774_v27, %s1602_s29 }
 0x2ad   : > { %881 = vrot.lane.b32.xlu1 %v759_v25, %s1601_s28 }
 0x2ae   : > { %903 = vrot.lane.b32.xlu0 %v780_v28, %s1604_s11 }
 0x2b1   : > { %835 = vrot.lane.b32.xlu1 %v770_v33, %s1603_s30 }
 0x2b2   : > { %833 = vrot.lane.b32.xlu0 %v769_v29, %s1603_s30 }
 0x2b5   : > { %925 = vrot.lane.b32.xlu1 %v784_v36, %s1605_s12 }
 0x2b6   : > { %927 = vrot.lane.b32.xlu0 %v785_v30, %s1605_s12 }
 0x2b9   : > { %861 = vrot.lane.b32.xlu1 %v776_v47, %s1602_s29 }
 0x2ba   : > { %859 = vrot.lane.b32.xlu0 %v775_v35, %s1602_s29 }
 0x2bd   : > { %923 = vrot.lane.b32.xlu1 %v783_v43, %s1605_s12 }
 0x2be   : > { %929 = vrot.lane.b32.xlu0 %v786_v31, %s1605_s12 }
 0x2c1   : > { %945 = vrot.lane.b32.xlu1 %v1870_v4, %s1606_s15 }
 0x2c2   : > { %947 = vrot.lane.b32.xlu0 %v1873_v5, %s1606_s15 }
 0x2c5   : > { %943 = vrot.lane.b32.xlu1 %v1867_v1, %s1606_s15 }
 0x2c6   : > { %971 = vrot.lane.b32.xlu0 %v790_v37, %s1607_s18 }
 0x2c9   : > { %907 = vrot.lane.b32.xlu1 %v782_v40, %s1604_s11 }
 0x2ca   : > { %905 = vrot.lane.b32.xlu0 %v781_v50, %s1604_s11 }
 0x2cd   : > { %973 = vrot.lane.b32.xlu1 %v791_v32, %s1607_s18 }
 0x2ce   : > { %969 = vrot.lane.b32.xlu0 %v789_v34, %s1607_s18 }
 0x2d1   : > { %933 = vrot.lane.b32.xlu1 %v788_v38, %s1605_s12 }
 0x2d2   : > { %931 = vrot.lane.b32.xlu0 %v787_v44, %s1605_s12 }
 0x2d5   : > { %951 = vrot.lane.b32.xlu1 %v1893_v13, %s1606_s15 }
 0x2d6   : > { %953 = vrot.lane.b32.xlu0 %v759_v25, %s1606_s15 }
 0x2d9   : > { %949 = vrot.lane.b32.xlu1 %v1888_v9, %s1606_s15 }
 0x2da   : > { %977 = vrot.lane.b32.xlu0 %v793_v49, %s1607_s18 }
 0x2dd   : > { %979 = vrot.lane.b32.xlu1 %v794_v53, %s1607_s18 }
 0x2de   : > { %975 = vrot.lane.b32.xlu0 %v792_v39, %s1607_s18 }
 0x2e1   : > { %1003 = vperm.xlu1 %1554, %v997_v41  }
 0x2e2   : > { %1008 = vperm.xlu0 %1553, %v998_v61  }
 0x2e5   : > { %1013 = vperm.xlu1 %1554, %v999_v58  }
 0x2e6   : > { %1018 = vperm.xlu0 %1553, %v1000_v60  }
 0x2f3   : > { %v800_v42 = vpop.permute.xlu1 %799 }
 0x2f4   : > { %v804_v45 = vpop.permute.xlu0 %803 }
 0x2f7   : > { %v872_v46 = vpop.permute.xlu1 %871 }
 0x2f8   : > { %v876_v48 = vpop.permute.xlu0 %875 }
 0x2fb   : > { %v802_v51 = vpop.permute.xlu1 %801 }
 0x2fc   : > { %v830_v52 = vpop.permute.xlu0 %829  ;;  %v812_v55 = vsel %vm510_vm6, %v802_v51, %v804_v45  ;;  %v811_v56 = vsel %vm510_vm6, %v800_v42, %v802_v51 }
 0x2fd   : > { %1062 = vmatprep.subr.bf16.mxu1 %v812_v55 }
 0x2fe   : > { %1063 = vmatpush1.bf16.msra.mxu1 %v811_v56 }
 0x2ff   : > { %v874_v57 = vpop.permute.xlu1 %873 }
 0x300   : > { %v856_v59 = vpop.permute.xlu0 %855  ;;  %v884_v35 = vsel %vm549_vm9, %v874_v57, %v876_v48  ;;  %v883_v31 = vsel %vm549_vm9, %v872_v46, %v874_v57 }
 0x303   : > { %v826_v62 = vpop.permute.xlu1 %825 }
 0x304   : > { %v902_v63 = vpop.permute.xlu0 %901 }
 0x307   : > { %v852_v0 = vpop.permute.xlu1 %851 }
 0x308   : > { %v806_v1 = vpop.permute.xlu0 %805 }
 0x30b   : > { %v898_v3 = vpop.permute.xlu1 %897 }
 0x30c   : > { %v878_v4 = vpop.permute.xlu0 %877 }
 0x30f   : > { %v828_v5 = vpop.permute.xlu1 %827 }
 0x310   : > { %v808_v6 = vpop.permute.xlu0 %807  ;;  %v838_v17 = vsel %vm524_vm7, %v828_v5, %v830_v52  ;;  %v837_v22 = vsel %vm524_vm7, %v826_v62, %v828_v5 }
 0x311   : > { %v813_v16 = vsel %vm510_vm6, %v806_v1, %v808_v6 }
 0x313   : > { %v854_v7 = vpop.permute.xlu1 %853 }
 0x314   : > { %v880_v8 = vpop.permute.xlu0 %879  ;;  %v864_v25 = vsel %vm538_vm8, %v854_v7, %v856_v59  ;;  %v863_v28 = vsel %vm538_vm8, %v852_v0, %v854_v7 }
 0x315   : > { %v885_v32 = vsel %vm549_vm9, %v878_v4, %v880_v8  ;;  %v1561_v4 = vld [vmem:[%s2200_s4] ss:$12 sps:$4 sm:$0xff]  }
 0x317   : > { %v900_v9 = vpop.permute.xlu1 %899 }
 0x318   : > { %v832_v10 = vpop.permute.xlu0 %831  ;;  %v910_v38 = vsel %vm563_vm10, %v900_v9, %v902_v63  ;;  %v909_v54 = vsel %vm563_vm10, %v898_v3, %v900_v9 }
 0x31b   : > { %v810_v12 = vpop.permute.xlu1 %809 }
 0x31c   : > { %v858_v13 = vpop.permute.xlu0 %857  ;;  %v814_v14 = vsel %vm510_vm6, %v808_v6, %v810_v12  ;;  %v1565_v6 = vld [vmem:[%s2200_s4 + $0x1c] ss:$12 sps:$4 sm:$0xff]   ;;  %v1567_v12 = vld [vmem:[%s2200_s4 + $0x18] ss:$12 sps:$4 sm:$0xff]  }
 0x31d   : > { %1064 = vmatprep.subr.bf16.mxu1 %v814_v14  ;;  %v1609_v14 = vmov 0.0  }
 0x31e   : > { %1065 = vmatpush1.bf16.msra.mxu1 %v813_v16  ;;  %v1251_v16 = vld [vmem:[%s2204_s8 + $0x18] sm:$0xff] }
 0x31f   : > { %v882_v18 = vpop.permute.xlu1 %881  ;;  %1066 = vmatprep.subr.bf16.mxu1 %v838_v17 }
 0x320   : > { %v904_v19 = vpop.permute.xlu0 %903  ;;  %v886_v40 = vsel %vm549_vm9, %v880_v8, %v882_v18 }
 0x322   : > { %1067 = vmatpush1.bf16.msra.mxu1 %v837_v22 }
 0x323   : > { %v836_v26 = vpop.permute.xlu1 %835 }
 0x324   : > { %v834_v20 = vpop.permute.xlu0 %833 }
 0x325   : > { %v840_v21 = vsel %vm524_vm7, %v834_v20, %v836_v26  ;;  %v839_v23 = vsel %vm524_vm7, %v832_v10, %v834_v20  ;;  %v1564_v10 = vld [vmem:[%s2200_s4 + $0x8] ss:$12 sps:$4 sm:$0xff]  }
 0x326   : > { %1068 = vmatprep.subr.bf16.mxu1 %v840_v21 }
 0x327   : > { %v926_v24 = vpop.permute.xlu1 %925  ;;  %1069 = vmatpush1.bf16.msra.mxu1 %v839_v23 }
 0x328   : > { %1070 = vmatprep.subr.bf16.mxu1 %v864_v25  ;;  %v928_v27 = vpop.permute.xlu0 %927 }
 0x329   : > { %v936_v58 = vsel %vm577_vm11, %v926_v24, %v928_v27 }
 0x32b   : > { %v862_v33 = vpop.permute.xlu1 %861  ;;  %1071 = vmatpush1.bf16.msra.mxu1 %v863_v28 }
 0x32c   : > { %v860_v29 = vpop.permute.xlu0 %859 }
 0x32d   : > { %v866_v36 = vsel %vm538_vm8, %v860_v29, %v862_v33  ;;  %v865_v30 = vsel %vm538_vm8, %v858_v13, %v860_v29  ;;  %v1568_v13 = vld [vmem:[%s2200_s4 + $0x20] ss:$12 sps:$4 sm:$0xff]  }
 0x32e   : > { %1072 = vmatprep.subr.bf16.mxu1 %v866_v36 }
 0x32f   : > { %v924_v47 = vpop.permute.xlu1 %923  ;;  %1073 = vmatpush1.bf16.msra.mxu1 %v865_v30 }
 0x330   : > { %1074 = vmatprep.subr.bf16.mxu1 %v884_v35  ;;  %v930_v43 = vpop.permute.xlu0 %929  ;;  %v935_v46 = vsel %vm577_vm11, %v924_v47, %v926_v24 }
 0x333   : > { %v946_v37 = vpop.permute.xlu1 %945  ;;  %1075 = vmatpush1.bf16.msra.mxu1 %v883_v31 }
 0x334   : > { %1076 = vmatprep.subr.bf16.mxu1 %v886_v40  ;;  %v948_v50 = vpop.permute.xlu0 %947 }
 0x335   : > { %v956_v57 = vsel %vm588_vm12, %v946_v37, %v948_v50 }
 0x337   : > { %v944_v34 = vpop.permute.xlu1 %943  ;;  %1077 = vmatpush1.bf16.msra.mxu1 %v885_v32 }
 0x338   : > { %1078 = vmatprep.subr.bf16.mxu1 %v910_v38  ;;  %v972_v44 = vpop.permute.xlu0 %971  ;;  %v955_v62 = vsel %vm588_vm12, %v944_v34, %v946_v37 }
 0x33b   : > { %v908_v49 = vpop.permute.xlu1 %907  ;;  %1079 = vmatpush1.bf16.msra.mxu1 %v909_v54 }
 0x33c   : > { %v906_v53 = vpop.permute.xlu0 %905 }
 0x33d   : > { %v912_v39 = vsel %vm563_vm10, %v906_v53, %v908_v49  ;;  %v911_v41 = vsel %vm563_vm10, %v904_v19, %v906_v53 }
 0x33e   : > { %1080 = vmatprep.subr.bf16.mxu1 %v912_v39 }
 0x33f   : > { %v974_v61 = vpop.permute.xlu1 %973  ;;  %1081 = vmatpush1.bf16.msra.mxu1 %v911_v41 }
 0x340   : > { %1082 = vmatprep.subr.bf16.mxu1 %v936_v58  ;;  %v970_v60 = vpop.permute.xlu0 %969  ;;  %v982_v42 = vsel %vm602_vm13, %v972_v44, %v974_v61 }
 0x341   : > { %v981_v45 = vsel %vm602_vm13, %v970_v60, %v972_v44  ;;  %1111 = vmatprep.subr.bf16.mxu0 %v982_v42 }
 0x342   : > { %1112 = vmatpush1.bf16.msra.mxu0 %v981_v45 }
 0x343   : > { %v934_v48 = vpop.permute.xlu1 %933  ;;  %1083 = vmatpush1.bf16.msra.mxu1 %v935_v46 }
 0x344   : > { %v932_v51 = vpop.permute.xlu0 %931 }
 0x345   : > { %v938_v52 = vsel %vm577_vm11, %v932_v51, %v934_v48  ;;  %v937_v55 = vsel %vm577_vm11, %v930_v43, %v932_v51 }
 0x346   : > { %1084 = vmatprep.subr.bf16.mxu1 %v938_v52 }
 0x347   : > { %v952_v56 = vpop.permute.xlu1 %951  ;;  %1085 = vmatpush1.bf16.msra.mxu1 %v937_v55  ;;  %v1182_v55 = vld [vmem:[%s2202_s6 + $0x8] sm:$0xff] }
 0x348   : > { %1086 = vmatprep.subr.bf16.mxu1 %v956_v57  ;;  %v954_v59 = vpop.permute.xlu0 %953 }
 0x349   : > { %v958_v0 = vsel %vm588_vm12, %v952_v56, %v954_v59 }
 0x34b   : > { %v950_v63 = vpop.permute.xlu1 %949  ;;  %1087 = vmatpush1.bf16.msra.mxu1 %v955_v62  ;;  %v1181_v62 = vld [vmem:[%s2202_s6] sm:$0xff] }
 0x34c   : > { %1088 = vmatprep.subr.bf16.mxu1 %v958_v0  ;;  %v978_v1 = vpop.permute.xlu0 %977  ;;  %v957_v3 = vsel %vm588_vm12, %v950_v63, %v952_v56 }
 0x34f   : > { %v980_v5 = vpop.permute.xlu1 %979  ;;  %1089 = vmatpush1.bf16.msra.mxu1 %v957_v3 }
 0x350   : > { %v976_v7 = vpop.permute.xlu0 %975  ;;  %v984_v8 = vsel %vm602_vm13, %v978_v1, %v980_v5 }
 0x351   : > { %v983_v9 = vsel %vm602_vm13, %v976_v7, %v978_v1  ;;  %1113 = vmatprep.subr.bf16.mxu0 %v984_v8  ;;  %v1183_v1 = vld [vmem:[%s2202_s6 + $0x10] sm:$0xff] }
 0x352   : > { %1091 = vmatmul.mubr.bf16.vlgmr.msra.gmra.mrb[0].mxu1 %v1561_v4  ;;  %1114 = vmatpush1.bf16.msra.mxu0 %v983_v9 }
 0x353   : > { %1100 = vmatprep.mubr.bf16.mxu1 %v1565_v6  ;;  %1509 = vmatprep.subr.bf16.mxu0 %v1686_v15  ;;  %v1248_v15 = vld [vmem:[%s2204_s8] sm:$0xff]  ;;  %v1184_v6 = vld [vmem:[%s2202_s6 + $0x18] sm:$0xff] }
 0x355   : > { %1494 = vmatmul.mubr.msk.bf16.vlgmr.msra.gmra.mrb[8].mxu0 %vm482_vm3, %v1564_v10 }
 0x356   : > { %1153 = vmatprep.mubr.bf16.mxu0 %v1608_v2  ;;  %1511 = vmatpush1.bf16.msra.mxu0 %v1682_v11  ;;  %v1249_v11 = vld [vmem:[%s2204_s8 + $0x8] sm:$0xff]  ;;  %v1250_v2 = vld [vmem:[%s2204_s8 + $0x10] sm:$0xff] }
 0x35a   : > { %1101 = vmatmul.mubr.bf16.gmra.mrb[4].mxu1 %v1567_v12 }
 0x35d   : > { %1495 = vmatmul.mubr.msk.bf16.gmra.mrb[12].mxu0 %vm482_vm3, %v1568_v13 }
 0x35e   : > { %1352 = vmatprep.mubr.f32.mxu0 %v1609_v14 }
 0x360   : > { %v1004_v17 = vpop.permute.xlu1 %1003 }
 0x361   : > { %v1009_v26 = vpop.permute.xlu0 %1008 }
 0x364   : > { %v1014_v31 = vpop.permute.xlu1 %1013 }
 0x365   : > { %1500 = vmatmul.mubr.msk.f32.vlgmr.msra.gmra.mrb[16].mxu0 %vm458_vm1, %v1248_v15  ;;  %v1019_v34 = vpop.permute.xlu0 %1018 }
 0x366   : > { %1358 = vmatprep.mubr.f32.mxu0 %v1609_v14 }
 0x369   : > { %1501 = vmatmul.mubr.msk.f32.gmra.mrb[18].mxu0 %vm458_vm1, %v1249_v11 }
 0x36a   : > { %1364 = vmatprep.mubr.f32.mxu0 %v1609_v14 }
 0x36d   : > { %1502 = vmatmul.mubr.msk.f32.gmra.mrb[20].mxu0 %vm458_vm1, %v1250_v2 }
 0x36e   : > { %1370 = vmatprep.mubr.f32.mxu0 %v1609_v14 }
 0x371   : > { %1503 = vmatmul.mubr.msk.f32.gmra.mrb[22].mxu0 %vm458_vm1, %v1251_v16 }
 0x425   : > { %v1092_v18 = vpop.f32.mrb[0].mxu1 }
 0x426   : > { %v1093_v19 = vadd.f32 %v1092_v18, %v1004_v17  ;;  %v1094_v22 = vpop.f32.mrb[1].mxu1 }
 0x427   : > { %v1095_v20 = vadd.f32 %v1094_v22, %v1004_v17  ;;  %v1096_v21 = vpop.f32.mrb[2].mxu1 }
 0x428   : > { %v1097_v23 = vadd.f32 %v1096_v21, %v1009_v26  ;;  %v1098_v24 = vpop.f32.mrb[3].mxu1  ;;  %v1145_v25 = vpop.f32.mrb[8].mxu0  ;;  %v1204_v21 = vld [vmem:[%s2203_s7] sm:$0xff] }
 0x429   : > { %v1099_v27 = vadd.f32 %v1098_v24, %v1009_v26  ;;  %v2091_v28 = vadd.f32 %v1145_v25, %v1093_v19  ;;  %v1147_v33 = vpop.f32.mrb[9].mxu0  ;;  %v1206_v24 = vld [vmem:[%s2203_s7 + $0x10] sm:$0xff] }
 0x42a   : > { %v2093_v29 = vadd.f32 %v1147_v33, %v1095_v20  ;;  %v1149_v36 = vpop.f32.mrb[10].mxu0  ;;  %v1205_v20 = vld [vmem:[%s2203_s7 + $0x8] sm:$0xff] }
 0x42b   : > { %v2095_v30 = vadd.f32 %v1149_v36, %v1097_v23  ;;  %v1151_v47 = vpop.f32.mrb[11].mxu0 }
 0x42c   : > { %v2097_v35 = vadd.f32 %v1151_v47, %v1099_v27  ;;  %v1164_v43 = vadd.f32 %v2093_v29, %v2091_v28 }
 0x42d   : > { %v1102_v37 = vpop.f32.mrb[4].mxu1 }
 0x42e   : > { %v1103_v40 = vadd.f32 %v1102_v37, %v1014_v31  ;;  %v1104_v50 = vpop.f32.mrb[5].mxu1  ;;  %1165 = vadd.xlane.f32.xlu1 %v1164_v43  ;;  %v1167_v32 = vadd.f32 %v2097_v35, %v2095_v30 }
 0x42f   : > { %v1105_v38 = vadd.f32 %v1104_v50, %v1014_v31  ;;  %v1106_v44 = vpop.f32.mrb[6].mxu1  ;;  %v1253_v31 = vld [vmem:[%s2205_s9 + $0x8] sm:$0xff] }
 0x430   : > { %v1107_v54 = vadd.f32 %v1106_v44, %v1019_v34  ;;  %v1108_v49 = vpop.f32.mrb[7].mxu1  ;;  %v1155_v53 = vpop.f32.mrb[12].mxu0  ;;  %1168 = vadd.xlane.f32.xlu0 %v1167_v32 }
 0x431   : > { %v1109_v39 = vadd.f32 %v1108_v49, %v1019_v34  ;;  %v2103_v41 = vadd.f32 %v1155_v53, %v1103_v40  ;;  %v1157_v61 = vpop.f32.mrb[13].mxu0  ;;  %v1252_v34 = vld [vmem:[%s2205_s9] sm:$0xff] }
 0x432   : > { %v2105_v58 = vadd.f32 %v1157_v61, %v1105_v38  ;;  %v1159_v60 = vpop.f32.mrb[14].mxu0  ;;  %v1255_v38 = vld [vmem:[%s2205_s9 + $0x18] sm:$0xff] }
 0x433   : > { %v2107_v42 = vadd.f32 %v1159_v60, %v1107_v54  ;;  %v1161_v45 = vpop.f32.mrb[15].mxu0 }
 0x434   : > { %v1170_v46 = vadd.f32 %v2105_v58, %v2103_v41  ;;  %v2111_v48 = vadd.f32 %v1161_v45, %v1109_v39  ;;  %v1207_v39 = vld [vmem:[%s2203_s7 + $0x18] sm:$0xff]  ;;  %v1254_v45 = vld [vmem:[%s2205_s9 + $0x10] sm:$0xff] }
 0x436   : > { %v1173_v51 = vadd.f32 %v2111_v48, %v2107_v42  ;;  %1171 = vadd.xlane.f32.xlu0 %v1170_v46 }
 0x438   : > { %1174 = vadd.xlane.f32.xlu1 %v1173_v51  ;;  %v1354_v37 = vpop.f32.mrb[16].mxu0 }
 0x439   : > { %v1356_v40 = vpop.f32.mrb[17].mxu0 }
 0x43c   : > { %v1360_v50 = vpop.f32.mrb[18].mxu0 }
 0x43d   : > { %v1362_v32 = vpop.f32.mrb[19].mxu0 }
 0x440   : > { %v2152_v44 = vpop.f32.mrb[20].mxu0 }
 0x441   : > { %v2154_v54 = vpop.f32.mrb[21].mxu0 }
 0x444   : > { %v2156_v49 = vpop.f32.mrb[22].mxu0 }
 0x445   : > { %v2158_v53 = vpop.f32.mrb[23].mxu0 }
 0x4bb   : > { %v1166_v52 = vpop.xlane.xlu1 %1165 }
 0x4bc   : > { %v1177_v57 = vmul.f32 0.00390625, %v1166_v52 }
 0x4bd   : > { %v1169_v56 = vpop.xlane.xlu0 %1168 }
 0x4be   : > { %v1178_v59 = vmul.f32 0.00390625, %v1169_v56  ;;  %v1185_v0 = vmul.f32 %v1181_v62, %v1177_v57 }
 0x4c0   : > { %v1186_v63 = vmul.f32 %v1182_v55, %v1178_v59  ;;  %v1190_v8 = vsel %vm444_vm2, %v1185_v0, 0.0 }
 0x4c2   : > { %v1191_v4 = vsel %vm444_vm2, %v1186_v63, 0.0 }
 0x4c3   : > { %v1172_v3 = vpop.xlane.xlu0 %1171  ;;  %v1192_v12 = vadd.f32 %v1191_v4, %v1190_v8 }
 0x4c4   : > { %v1179_v5 = vmul.f32 0.00390625, %v1172_v3 }
 0x4c5   : > { %v1175_v7 = vpop.xlane.xlu1 %1174 }
 0x4c6   : > { %v1187_v9 = vmul.f32 %v1183_v1, %v1179_v5  ;;  %v1180_v10 = vmul.f32 0.00390625, %v1175_v7 }
 0x4c8   : > { %v1193_v13 = vsel %vm444_vm2, %v1187_v9, 0.0  ;;  %v1188_v15 = vmul.f32 %v1184_v6, %v1180_v10 }
 0x4c9   : > { %v1194_v14 = vadd.f32 %v1193_v13, %v1192_v12 }
 0x4ca   : > { %v1195_v11 = vsel %vm444_vm2, %v1188_v15, 0.0 }
 0x4cb   : > { %v1196_v2 = vadd.f32 %v1195_v11, %v1194_v14 }
 0x4cd   : > { %v1197_v16 = vrot.slane %v1196_v2, 4 }
 0x4cf   : > { %v1198_v17 = vadd.f32 %v1197_v16, %v1196_v2 }
 0x4d1   : > { %v1199_v18 = vrot.slane %v1198_v17, 2 }
 0x4d3   : > { %v1200_v19 = vadd.f32 %v1199_v18, %v1198_v17 }
 0x4d5   : > { %v1201_v22 = vrot.slane %v1200_v19, 1 }
 0x4d7   : > { %v1202_v26 = vadd.f32 %v1201_v22, %v1200_v19 }
 0x4d9   : > { %v1203_v23 = vmax.f32 %v1202_v26, 0.0 }
 0x4db   : > { %v1209_v25 = vmul.f32 %v1205_v20, %v1203_v23  ;;  %v1208_v27 = vmul.f32 %v1204_v21, %v1203_v23  ;;  %v1210_v47 = vmul.f32 %v1206_v24, %v1203_v23  ;;  %v1211_v61 = vmul.f32 %v1207_v39, %v1203_v23 }
 0x4dd   : > { %v1215_v33 = vsel %vm444_vm2, %v1209_v25, 0.0  ;;  %v1212_v36 = vsel %vm444_vm2, %v1208_v27, 0.0  ;;  %v1218_v43 = vsel %vm444_vm2, %v1210_v47, 0.0  ;;  %v1221_v60 = vsel %vm444_vm2, %v1211_v61, 0.0 }
 0x4de   : > { %1216 = vadd.xlane.f32.xlu1 %v1215_v33  ;;  %1213 = vadd.xlane.f32.xlu0 %v1212_v36 }
 0x4e2   : > { %1219 = vadd.xlane.f32.xlu0 %v1218_v43 }
 0x4ef   : > { %1263 = vperm.xlu1 %1554, %v1253_v31  }
 0x4f8   : > { %1258 = vperm.xlu0 %1553, %v1252_v34  }
 0x4fc   : > { %1273 = vperm.xlu0 %1553, %v1255_v38  }
 0x513   : > { %1222 = vadd.xlane.f32.xlu1 %v1221_v60 }
 0x524   : > { %1268 = vperm.xlu1 %1554, %v1254_v45  }
 0x56b   : > { %v1217_v46 = vpop.xlane.xlu1 %1216  ;;  %v1214_v51 = vpop.xlane.xlu0 %1213 }
 0x56c   : > { %v1497_v52 = vmul.f32 -1.442695, %v1217_v46  ;;  %v1496_v55 = vmul.f32 -1.442695, %v1214_v51 }
 0x56e   : > { %1569 = vpow2.f32 %v1497_v52 }
 0x56f   : > { %1571 = vpow2.f32 %v1496_v55  ;;  %v1220_v63 = vpop.xlane.xlu0 %1219  ;;  %v1264_v0 = vpop.permute.xlu1 %1263 }
 0x570   : > { %v1498_v1 = vmul.f32 -1.442695, %v1220_v63  ;;  %v1361_v5 = vadd.f32 %v1360_v50, %v1264_v0  ;;  %v1363_v9 = vadd.f32 %v1362_v32, %v1264_v0 }
 0x577   : > { %v1259_v3 = vpop.permute.xlu0 %1258 }
 0x578   : > { %v1570_v56 = vpop.eup %1569  ;;  %v1355_v13 = vadd.f32 %v1354_v37, %v1259_v3  ;;  %v1357_v15 = vadd.f32 %v1356_v40, %v1259_v3 }
 0x579   : > { %v1572_v57 = vpop.eup %1571  ;;  %v1237_v59 = vadd.f32 1.0, %v1570_v56 }
 0x57a   : > { %v1236_v62 = vadd.f32 1.0, %v1572_v57 }
 0x57b   : > { %1573 = vrcp.f32 %v1237_v59 }
 0x57c   : > { %1575 = vrcp.f32 %v1236_v62 }
 0x57d   : > { %1577 = vpow2.f32 %v1498_v1 }
 0x585   : > { %v1574_v4 = vpop.eup %1573 }
 0x586   : > { %v1576_v6 = vpop.eup %1575  ;;  %v1379_v7 = vmul.f32 %v1574_v4, %v2095_v30  ;;  %v1380_v8 = vmul.f32 %v1574_v4, %v2097_v35 }
 0x587   : > { %v1377_v10 = vmul.f32 %v1576_v6, %v2091_v28  ;;  %v1378_v12 = vmul.f32 %v1576_v6, %v2093_v29  ;;  %v1578_v26 = vpop.eup %1577 }
 0x588   : > { %v1387_v14 = vadd.f32 %v1379_v7, %v1361_v5  ;;  %v1388_v11 = vadd.f32 %v1380_v8, %v1363_v9  ;;  %v1238_v20 = vadd.f32 1.0, %v1578_v26 }
 0x589   : > { %v1385_v2 = vadd.f32 %v1377_v10, %v1355_v13  ;;  %v1386_v16 = vadd.f32 %v1378_v12, %v1357_v15 }
 0x58a   : > { %v1395_v17 = vmax.f32 %v1387_v14, 0.0  ;;  %v1396_v18 = vmax.f32 %v1388_v11, 0.0  ;;  %1579 = vrcp.f32 %v1238_v20 }
 0x58b   : > { %v1393_v28 = vmax.f32 %v1385_v2, 0.0  ;;  %v1394_v29 = vmax.f32 %v1386_v16, 0.0 }
 0x58c   : > { %v1403_v30 = vmin.f32 %v1395_v17, 6.0  ;;  %v1404_v35 = vmin.f32 %v1396_v18, 6.0 }
 0x58d   : > { %v1401_v19 = vmin.f32 %v1393_v28, 6.0  ;;  %v1402_v22 = vmin.f32 %v1394_v29, 6.0 }
 0x58e   : > { %1411 = vst [vmem:[%s2175_s27 + $0x10] sm:$0xff] %v1403_v30  ;;  %1412 = vst [vmem:[%s2175_s27 + $0x18] sm:$0xff] %v1404_v35 }
 0x58f   : > { %1409 = vst [vmem:[%s2175_s27] sm:$0xff] %v1401_v19  ;;  %1410 = vst [vmem:[%s2175_s27 + $0x8] sm:$0xff] %v1402_v22 }
 0x594   : > { %v1580_v24 = vpop.eup %1579 }
 0x595   : > { %v1381_v36 = vmul.f32 %v1580_v24, %v2103_v41  ;;  %v1382_v47 = vmul.f32 %v1580_v24, %v2105_v58 }
 0x5a0   : > { %v1223_v21 = vpop.xlane.xlu1 %1222 }
 0x5a1   : > { %v1499_v23 = vmul.f32 -1.442695, %v1223_v21 }
 0x5a3   : > { %1581 = vpow2.f32 %v1499_v23 }
 0x5a4   : > { %v1269_v25 = vpop.permute.xlu1 %1268 }
 0x5a5   : > { %v1367_v27 = vadd.f32 %v2152_v44, %v1269_v25  ;;  %v1369_v33 = vadd.f32 %v2154_v54, %v1269_v25  ;;  %v1274_v44 = vpop.permute.xlu0 %1273 }
 0x5a6   : > { %v1373_v54 = vadd.f32 %v2156_v49, %v1274_v44  ;;  %v1375_v41 = vadd.f32 %v2158_v53, %v1274_v44 }
 0x5a7   : > { %v1389_v43 = vadd.f32 %v1381_v36, %v1367_v27  ;;  %v1390_v31 = vadd.f32 %v1382_v47, %v1369_v33 }
 0x5a9   : > { %v1397_v37 = vmax.f32 %v1389_v43, 0.0  ;;  %v1398_v40 = vmax.f32 %v1390_v31, 0.0 }
 0x5ab   : > { %v1405_v50 = vmin.f32 %v1397_v37, 6.0  ;;  %v1406_v32 = vmin.f32 %v1398_v40, 6.0 }
 0x5ad   : > { %v1582_v34 = vpop.eup %1581  ;;  %1413 = vst [vmem:[%s2175_s27 + $0x20] sm:$0xff] %v1405_v50  ;;  %1414 = vst [vmem:[%s2175_s27 + $0x28] sm:$0xff] %v1406_v32 }
 0x5ae   : > { %v1239_v38 = vadd.f32 1.0, %v1582_v34 }
 0x5b0   : > { %1583 = vrcp.f32 %v1239_v38 }
 0x5ba   : > { %v1584_v39 = vpop.eup %1583 }
 0x5bb   : > { %v1383_v58 = vmul.f32 %v1584_v39, %v2107_v42  ;;  %v1384_v61 = vmul.f32 %v1584_v39, %v2111_v48 }
 0x5bd   : > { %v1391_v60 = vadd.f32 %v1383_v58, %v1373_v54  ;;  %v1392_v45 = vadd.f32 %v1384_v61, %v1375_v41 }
 0x5bf   : > { %v1399_v46 = vmax.f32 %v1391_v60, 0.0  ;;  %v1400_v51 = vmax.f32 %v1392_v45, 0.0 }
 0x5c1   : > { %v1407_v52 = vmin.f32 %v1399_v46, 6.0  ;;  %v1408_v55 = vmin.f32 %v1400_v51, 6.0 }
 0x5c3   : > { %1415 = vst [vmem:[%s2175_s27 + $0x30] sm:$0xff] %v1407_v52  ;;  %1416 = vst [vmem:[%s2175_s27 + $0x38] sm:$0xff] %v1408_v55 }
 0x5c4 PF: > { %s20_s13 = sadd.s32 1, %s1591_s13  }
 0x5c5   : > { %p17_p4 = scmp.ge.s32.totalorder %s20_s13, 6  }
 0x5c7   :  { %19 = sbr.rel (!%p17_p4) target bundleno = 1 (0x1), region = 90 }

</bundles_post_ra>
